<compile_context>
chip_gen: v6e
topology: v6e:2x2x1
jax: 0.10.0
libtpu: 0.0.40
codegen_flags: <defaults>
</compile_context>

<pallas_src>
import math

import jax
import jax.numpy as jnp
from jax import lax
from jax.experimental import pallas as pl
from jax.experimental.pallas import tpu as pltpu


def _make_gca_kernel(C, HW):
    inv_hw = 1.0 / float(HW)

    def kernel(p_ref, w9_ref, scale_ref, bias_ref, m_ref, o_ref):
        # p_ref:     (1, 9, C, HW)  shifted 3x3 patches for this batch element
        # w9_ref:    (9, C, C)      conv weight per tap, [tap, c_out, c_in]
        # scale_ref: (C, 1)         folded BatchNorm scale
        # bias_ref:  (C, 1)         folded BatchNorm bias
        # m_ref:     (C, C)         channel-wise Conv1d as a band matrix
        # o_ref:     (1, C, HW)     gated output
        acc = jnp.zeros((C, HW), jnp.float32)
        for t in range(9):                     # static unroll: 9 MXU matmuls
            acc = acc + jnp.dot(w9_ref[t], p_ref[0, t],
                                preferred_element_type=jnp.float32)

        y = acc * scale_ref[...] + bias_ref[...]   # folded BatchNorm
        y = jnp.maximum(y, 0.0)                    # ReLU

        # wei = sigmoid(conv1d(avg_pool(y)));  conv1d(mean(y)) == mean(M @ y)
        my = jnp.dot(m_ref[...], y, preferred_element_type=jnp.float32)
        logits = jnp.sum(my, axis=1, keepdims=True) * inv_hw      # (C, 1)
        wei = 1.0 / (1.0 + jnp.exp(-logits))                      # sigmoid

        o_ref[0] = (y * wei).astype(o_ref.dtype)

    return kernel


def gca_block_forward(x, conv_w, gamma, beta, run_mean, run_var, conv1d_w,
                      eps=1e-5):
    """GCA_Block forward (inference-mode BatchNorm)."""
    N, C, H, W = x.shape
    HW = H * W
    f32 = jnp.float32

    # ---- XLA-side layout plumbing --------------------------------------
    # im2col: 9 shifted views of the zero-padded input, flattened so H*W is
    # on the 128-lane axis inside the kernel.
    xp = jnp.pad(x, ((0, 0), (0, 0), (1, 1), (1, 1)))
    taps = [xp[:, :, dy:dy + H, dx:dx + W].reshape(N, C, HW)
            for dy in range(3) for dx in range(3)]
    patches = jnp.stack(taps, axis=1)                          # (N, 9, C, HW)

    # conv weight -> per-tap (C_out, C_in) matrices
    w9 = jnp.transpose(conv_w, (2, 3, 0, 1)).reshape(9, C, C).astype(f32)

    # fold BatchNorm (inference) into per-channel scale / bias
    inv_std = 1.0 / jnp.sqrt(run_var.astype(f32) + eps)
    g = gamma.astype(f32)
    scale = (g * inv_std).reshape(C, 1)
    bias = (beta.astype(f32) - run_mean.astype(f32) * g * inv_std).reshape(C, 1)

    # Conv1d(1, 1, k, padding=(k-1)//2, bias=False) over channels as a band
    # matrix:  M[c, c + j - pad] = w1d[j]
    k = conv1d_w.shape[-1]
    pad = (k - 1) // 2
    k1d = conv1d_w.reshape(k).astype(f32)
    band = jnp.zeros((C, C), f32)
    for j in range(k):
        band = band + k1d[j] * jnp.eye(C, C, j - pad, dtype=f32)

    # ---- fused Pallas kernel -------------------------------------------
    itemsize = 4
    block_bytes = (9 * C * HW + C * HW + 10 * C * C + 2 * C) * itemsize
    vmem_limit = int(min(max(3 * block_bytes + (8 << 20), 16 << 20), 48 << 20))

    out = pl.pallas_call(
        _make_gca_kernel(C, HW),
        out_shape=jax.ShapeDtypeStruct((N, C, HW), x.dtype),
        grid=(N,),
        in_specs=[
            pl.BlockSpec((1, 9, C, HW), lambda n: (n, 0, 0, 0)),
            pl.BlockSpec((9, C, C), lambda n: (0, 0, 0)),
            pl.BlockSpec((C, 1), lambda n: (0, 0)),
            pl.BlockSpec((C, 1), lambda n: (0, 0)),
            pl.BlockSpec((C, C), lambda n: (0, 0)),
        ],
        out_specs=pl.BlockSpec((1, C, HW), lambda n: (n, 0, 0)),
        compiler_params=pltpu.CompilerParams(
            dimension_semantics=("parallel",),   # batch shards across TCs (v7x)
            vmem_limit_bytes=vmem_limit),
    )(patches, w9, scale, bias, band)

    return out.reshape(N, C, H, W)


gca_block_forward_jit = jax.jit(gca_block_forward)


def _gca_reference(x, conv_w, gamma, beta, run_mean, run_var, conv1d_w,
                   eps=1e-5):
    """Plain-JAX reference mirroring the PyTorch forward (eval-mode BN)."""
    y = lax.conv_general_dilated(
        x, conv_w, window_strides=(1, 1), padding=((1, 1), (1, 1)),
        dimension_numbers=("NCHW", "OIHW", "NCHW"),
        precision=lax.Precision.HIGHEST)
    inv_std = 1.0 / jnp.sqrt(run_var + eps)
    y = (y - run_mean[None, :, None, None]) * (gamma * inv_std)[None, :, None, None] \
        + beta[None, :, None, None]
    y = jnp.maximum(y, 0.0)
    pooled = jnp.mean(y, axis=(2, 3))                           # (N, C)
    k = conv1d_w.shape[-1]
    pad = (k - 1) // 2
    C = pooled.shape[1]
    pp = jnp.pad(pooled, ((0, 0), (pad, pad)))
    logits = jnp.zeros_like(pooled)
    for j in range(k):
        logits = logits + conv1d_w[0, 0, j] * pp[:, j:j + C]
    wei = 1.0 / (1.0 + jnp.exp(-logits))
    return y * wei[:, :, None, None]


if __name__ == "__main__":
    key = jax.random.PRNGKey(0)
    kx, kw, kg, kb, km, kv, k1 = jax.random.split(key, 7)

    N, C, H, W = 2, 4, 16, 16
    x = jax.random.normal(kx, (N, C, H, W), dtype=jnp.float32)
    conv_w = jax.random.normal(kw, (C, C, 3, 3), dtype=jnp.float32) * 0.2
    gamma = 1.0 + 0.1 * jax.random.normal(kg, (C,), dtype=jnp.float32)
    beta = 0.1 * jax.random.normal(kb, (C,), dtype=jnp.float32)
    run_mean = 0.1 * jax.random.normal(km, (C,), dtype=jnp.float32)
    run_var = jax.random.uniform(kv, (C,), jnp.float32, 0.5, 1.5)

    # kernel size exactly as the PyTorch module computes it
    t = int(abs((math.log(C, 2) + 1) / 2))
    kk = t if t % 2 else t + 1
    conv1d_w = jax.random.normal(k1, (1, 1, kk), dtype=jnp.float32) * 0.5

    y = gca_block_forward_jit(x, conv_w, gamma, beta, run_mean, run_var,
                              conv1d_w)
    jax.block_until_ready(y)

    y_ref = _gca_reference(x, conv_w, gamma, beta, run_mean, run_var, conv1d_w)
    assert y.shape == x.shape and y.dtype == x.dtype
    max_err = float(jnp.max(jnp.abs(y - y_ref)))
    assert jnp.allclose(y, y_ref, atol=1e-3, rtol=1e-3), f"max |err| = {max_err}"

    print("KERNEL_OK")
</pallas_src>

<mosaic_0001>
module attributes {stable_mosaic.version = 11 : i64} {
  func.func @kernel(%arg0: i32, %arg1: memref<1x9x4x256xf32, #tpu.memory_space<vmem>>, %arg2: memref<9x4x4xf32, #tpu.memory_space<vmem>>, %arg3: memref<4x1xf32, #tpu.memory_space<vmem>>, %arg4: memref<4x1xf32, #tpu.memory_space<vmem>>, %arg5: memref<4x4xf32, #tpu.memory_space<vmem>>, %arg6: memref<1x4x256xf32, #tpu.memory_space<vmem>>) attributes {dimension_semantics = [#tpu.dimension_semantics<parallel>], iteration_bounds = array<i64: 2>, scalar_prefetch = 0 : i64, scratch_operands = 0 : i64, tpu.core_type = #tpu.core_type<tc>, window_params = [{transform_indices = @transform_0, window_bounds = array<i64: 1, 9, 4, 256>}, {pipeline_mode = #tpu.pipeline_mode<synchronous>, transform_indices = @transform_1, window_bounds = array<i64: 9, 4, 4>}, {pipeline_mode = #tpu.pipeline_mode<synchronous>, transform_indices = @transform_2, window_bounds = array<i64: 4, 1>}, {pipeline_mode = #tpu.pipeline_mode<synchronous>, transform_indices = @transform_3, window_bounds = array<i64: 4, 1>}, {pipeline_mode = #tpu.pipeline_mode<synchronous>, transform_indices = @transform_4, window_bounds = array<i64: 4, 4>}, {transform_indices = @transform_5, window_bounds = array<i64: 1, 4, 256>}]} {
    %cst = arith.constant 0.000000e+00 : f32
    %0 = vector.broadcast %cst : f32 to vector<4x256xf32>
    %c0 = arith.constant 0 : index
    %c0_0 = arith.constant 0 : index
    %c0_1 = arith.constant 0 : index
    %1 = vector.load %arg2[%c0, %c0_0, %c0_1] : memref<9x4x4xf32, #tpu.memory_space<vmem>>, vector<1x4x4xf32>
    %2 = vector.shape_cast %1 : vector<1x4x4xf32> to vector<4x4xf32>
    %c0_2 = arith.constant 0 : index
    %c0_3 = arith.constant 0 : index
    %c0_4 = arith.constant 0 : index
    %c0_5 = arith.constant 0 : index
    %3 = vector.load %arg1[%c0_2, %c0_3, %c0_4, %c0_5] : memref<1x9x4x256xf32, #tpu.memory_space<vmem>>, vector<1x1x4x256xf32>
    %4 = vector.shape_cast %3 : vector<1x1x4x256xf32> to vector<4x256xf32>
    %cst_6 = arith.constant dense<0.000000e+00> : vector<4x256xf32>
    %5 = tpu.matmul %2, %4, %cst_6 {dimension_numbers = #tpu.dot_dimension_numbers<[1], [0], [0], [1], [0, 0, 1, 1], [], []>} : vector<4x4xf32>, vector<4x256xf32>, vector<4x256xf32> -> vector<4x256xf32>
    %6 = arith.addf %0, %5 : vector<4x256xf32>
    %c1 = arith.constant 1 : index
    %c0_7 = arith.constant 0 : index
    %c0_8 = arith.constant 0 : index
    %7 = vector.load %arg2[%c1, %c0_7, %c0_8] : memref<9x4x4xf32, #tpu.memory_space<vmem>>, vector<1x4x4xf32>
    %8 = vector.shape_cast %7 : vector<1x4x4xf32> to vector<4x4xf32>
    %c0_9 = arith.constant 0 : index
    %c1_10 = arith.constant 1 : index
    %c0_11 = arith.constant 0 : index
    %c0_12 = arith.constant 0 : index
    %9 = vector.load %arg1[%c0_9, %c1_10, %c0_11, %c0_12] : memref<1x9x4x256xf32, #tpu.memory_space<vmem>>, vector<1x1x4x256xf32>
    %10 = vector.shape_cast %9 : vector<1x1x4x256xf32> to vector<4x256xf32>
    %cst_13 = arith.constant dense<0.000000e+00> : vector<4x256xf32>
    %11 = tpu.matmul %8, %10, %cst_13 {dimension_numbers = #tpu.dot_dimension_numbers<[1], [0], [0], [1], [0, 0, 1, 1], [], []>} : vector<4x4xf32>, vector<4x256xf32>, vector<4x256xf32> -> vector<4x256xf32>
    %12 = arith.addf %6, %11 : vector<4x256xf32>
    %c2 = arith.constant 2 : index
    %c0_14 = arith.constant 0 : index
    %c0_15 = arith.constant 0 : index
    %13 = vector.load %arg2[%c2, %c0_14, %c0_15] : memref<9x4x4xf32, #tpu.memory_space<vmem>>, vector<1x4x4xf32>
    %14 = vector.shape_cast %13 : vector<1x4x4xf32> to vector<4x4xf32>
    %c0_16 = arith.constant 0 : index
    %c2_17 = arith.constant 2 : index
    %c0_18 = arith.constant 0 : index
    %c0_19 = arith.constant 0 : index
    %15 = vector.load %arg1[%c0_16, %c2_17, %c0_18, %c0_19] : memref<1x9x4x256xf32, #tpu.memory_space<vmem>>, vector<1x1x4x256xf32>
    %16 = vector.shape_cast %15 : vector<1x1x4x256xf32> to vector<4x256xf32>
    %cst_20 = arith.constant dense<0.000000e+00> : vector<4x256xf32>
    %17 = tpu.matmul %14, %16, %cst_20 {dimension_numbers = #tpu.dot_dimension_numbers<[1], [0], [0], [1], [0, 0, 1, 1], [], []>} : vector<4x4xf32>, vector<4x256xf32>, vector<4x256xf32> -> vector<4x256xf32>
    %18 = arith.addf %12, %17 : vector<4x256xf32>
    %c3 = arith.constant 3 : index
    %c0_21 = arith.constant 0 : index
    %c0_22 = arith.constant 0 : index
    %19 = vector.load %arg2[%c3, %c0_21, %c0_22] : memref<9x4x4xf32, #tpu.memory_space<vmem>>, vector<1x4x4xf32>
    %20 = vector.shape_cast %19 : vector<1x4x4xf32> to vector<4x4xf32>
    %c0_23 = arith.constant 0 : index
    %c3_24 = arith.constant 3 : index
    %c0_25 = arith.constant 0 : index
    %c0_26 = arith.constant 0 : index
    %21 = vector.load %arg1[%c0_23, %c3_24, %c0_25, %c0_26] : memref<1x9x4x256xf32, #tpu.memory_space<vmem>>, vector<1x1x4x256xf32>
    %22 = vector.shape_cast %21 : vector<1x1x4x256xf32> to vector<4x256xf32>
    %cst_27 = arith.constant dense<0.000000e+00> : vector<4x256xf32>
    %23 = tpu.matmul %20, %22, %cst_27 {dimension_numbers = #tpu.dot_dimension_numbers<[1], [0], [0], [1], [0, 0, 1, 1], [], []>} : vector<4x4xf32>, vector<4x256xf32>, vector<4x256xf32> -> vector<4x256xf32>
    %24 = arith.addf %18, %23 : vector<4x256xf32>
    %c4 = arith.constant 4 : index
    %c0_28 = arith.constant 0 : index
    %c0_29 = arith.constant 0 : index
    %25 = vector.load %arg2[%c4, %c0_28, %c0_29] : memref<9x4x4xf32, #tpu.memory_space<vmem>>, vector<1x4x4xf32>
    %26 = vector.shape_cast %25 : vector<1x4x4xf32> to vector<4x4xf32>
    %c0_30 = arith.constant 0 : index
    %c4_31 = arith.constant 4 : index
    %c0_32 = arith.constant 0 : index
    %c0_33 = arith.constant 0 : index
    %27 = vector.load %arg1[%c0_30, %c4_31, %c0_32, %c0_33] : memref<1x9x4x256xf32, #tpu.memory_space<vmem>>, vector<1x1x4x256xf32>
    %28 = vector.shape_cast %27 : vector<1x1x4x256xf32> to vector<4x256xf32>
    %cst_34 = arith.constant dense<0.000000e+00> : vector<4x256xf32>
    %29 = tpu.matmul %26, %28, %cst_34 {dimension_numbers = #tpu.dot_dimension_numbers<[1], [0], [0], [1], [0, 0, 1, 1], [], []>} : vector<4x4xf32>, vector<4x256xf32>, vector<4x256xf32> -> vector<4x256xf32>
    %30 = arith.addf %24, %29 : vector<4x256xf32>
    %c5 = arith.constant 5 : index
    %c0_35 = arith.constant 0 : index
    %c0_36 = arith.constant 0 : index
    %31 = vector.load %arg2[%c5, %c0_35, %c0_36] : memref<9x4x4xf32, #tpu.memory_space<vmem>>, vector<1x4x4xf32>
    %32 = vector.shape_cast %31 : vector<1x4x4xf32> to vector<4x4xf32>
    %c0_37 = arith.constant 0 : index
    %c5_38 = arith.constant 5 : index
    %c0_39 = arith.constant 0 : index
    %c0_40 = arith.constant 0 : index
    %33 = vector.load %arg1[%c0_37, %c5_38, %c0_39, %c0_40] : memref<1x9x4x256xf32, #tpu.memory_space<vmem>>, vector<1x1x4x256xf32>
    %34 = vector.shape_cast %33 : vector<1x1x4x256xf32> to vector<4x256xf32>
    %cst_41 = arith.constant dense<0.000000e+00> : vector<4x256xf32>
    %35 = tpu.matmul %32, %34, %cst_41 {dimension_numbers = #tpu.dot_dimension_numbers<[1], [0], [0], [1], [0, 0, 1, 1], [], []>} : vector<4x4xf32>, vector<4x256xf32>, vector<4x256xf32> -> vector<4x256xf32>
    %36 = arith.addf %30, %35 : vector<4x256xf32>
    %c6 = arith.constant 6 : index
    %c0_42 = arith.constant 0 : index
    %c0_43 = arith.constant 0 : index
    %37 = vector.load %arg2[%c6, %c0_42, %c0_43] : memref<9x4x4xf32, #tpu.memory_space<vmem>>, vector<1x4x4xf32>
    %38 = vector.shape_cast %37 : vector<1x4x4xf32> to vector<4x4xf32>
    %c0_44 = arith.constant 0 : index
    %c6_45 = arith.constant 6 : index
    %c0_46 = arith.constant 0 : index
    %c0_47 = arith.constant 0 : index
    %39 = vector.load %arg1[%c0_44, %c6_45, %c0_46, %c0_47] : memref<1x9x4x256xf32, #tpu.memory_space<vmem>>, vector<1x1x4x256xf32>
    %40 = vector.shape_cast %39 : vector<1x1x4x256xf32> to vector<4x256xf32>
    %cst_48 = arith.constant dense<0.000000e+00> : vector<4x256xf32>
    %41 = tpu.matmul %38, %40, %cst_48 {dimension_numbers = #tpu.dot_dimension_numbers<[1], [0], [0], [1], [0, 0, 1, 1], [], []>} : vector<4x4xf32>, vector<4x256xf32>, vector<4x256xf32> -> vector<4x256xf32>
    %42 = arith.addf %36, %41 : vector<4x256xf32>
    %c7 = arith.constant 7 : index
    %c0_49 = arith.constant 0 : index
    %c0_50 = arith.constant 0 : index
    %43 = vector.load %arg2[%c7, %c0_49, %c0_50] : memref<9x4x4xf32, #tpu.memory_space<vmem>>, vector<1x4x4xf32>
    %44 = vector.shape_cast %43 : vector<1x4x4xf32> to vector<4x4xf32>
    %c0_51 = arith.constant 0 : index
    %c7_52 = arith.constant 7 : index
    %c0_53 = arith.constant 0 : index
    %c0_54 = arith.constant 0 : index
    %45 = vector.load %arg1[%c0_51, %c7_52, %c0_53, %c0_54] : memref<1x9x4x256xf32, #tpu.memory_space<vmem>>, vector<1x1x4x256xf32>
    %46 = vector.shape_cast %45 : vector<1x1x4x256xf32> to vector<4x256xf32>
    %cst_55 = arith.constant dense<0.000000e+00> : vector<4x256xf32>
    %47 = tpu.matmul %44, %46, %cst_55 {dimension_numbers = #tpu.dot_dimension_numbers<[1], [0], [0], [1], [0, 0, 1, 1], [], []>} : vector<4x4xf32>, vector<4x256xf32>, vector<4x256xf32> -> vector<4x256xf32>
    %48 = arith.addf %42, %47 : vector<4x256xf32>
    %c8 = arith.constant 8 : index
    %c0_56 = arith.constant 0 : index
    %c0_57 = arith.constant 0 : index
    %49 = vector.load %arg2[%c8, %c0_56, %c0_57] : memref<9x4x4xf32, #tpu.memory_space<vmem>>, vector<1x4x4xf32>
    %50 = vector.shape_cast %49 : vector<1x4x4xf32> to vector<4x4xf32>
    %c0_58 = arith.constant 0 : index
    %c8_59 = arith.constant 8 : index
    %c0_60 = arith.constant 0 : index
    %c0_61 = arith.constant 0 : index
    %51 = vector.load %arg1[%c0_58, %c8_59, %c0_60, %c0_61] : memref<1x9x4x256xf32, #tpu.memory_space<vmem>>, vector<1x1x4x256xf32>
    %52 = vector.shape_cast %51 : vector<1x1x4x256xf32> to vector<4x256xf32>
    %cst_62 = arith.constant dense<0.000000e+00> : vector<4x256xf32>
    %53 = tpu.matmul %50, %52, %cst_62 {dimension_numbers = #tpu.dot_dimension_numbers<[1], [0], [0], [1], [0, 0, 1, 1], [], []>} : vector<4x4xf32>, vector<4x256xf32>, vector<4x256xf32> -> vector<4x256xf32>
    %54 = arith.addf %48, %53 : vector<4x256xf32>
    %c0_63 = arith.constant 0 : index
    %c0_64 = arith.constant 0 : index
    %55 = vector.load %arg3[%c0_63, %c0_64] : memref<4x1xf32, #tpu.memory_space<vmem>>, vector<4x1xf32>
    %56 = vector.broadcast %55 : vector<4x1xf32> to vector<4x256xf32>
    %57 = arith.mulf %54, %56 : vector<4x256xf32>
    %c0_65 = arith.constant 0 : index
    %c0_66 = arith.constant 0 : index
    %58 = vector.load %arg4[%c0_65, %c0_66] : memref<4x1xf32, #tpu.memory_space<vmem>>, vector<4x1xf32>
    %59 = vector.broadcast %58 : vector<4x1xf32> to vector<4x256xf32>
    %60 = arith.addf %57, %59 : vector<4x256xf32>
    %cst_67 = arith.constant 0.000000e+00 : f32
    %61 = vector.broadcast %cst_67 : f32 to vector<4x256xf32>
    %62 = arith.maximumf %60, %61 : vector<4x256xf32>
    %c0_68 = arith.constant 0 : index
    %c0_69 = arith.constant 0 : index
    %63 = vector.load %arg5[%c0_68, %c0_69] : memref<4x4xf32, #tpu.memory_space<vmem>>, vector<4x4xf32>
    %cst_70 = arith.constant dense<0.000000e+00> : vector<4x256xf32>
    %64 = tpu.matmul %63, %62, %cst_70 {dimension_numbers = #tpu.dot_dimension_numbers<[1], [0], [0], [1], [0, 0, 1, 1], [], []>} : vector<4x4xf32>, vector<4x256xf32>, vector<4x256xf32> -> vector<4x256xf32>
    %cst_71 = arith.constant dense<0.000000e+00> : vector<4xf32>
    %65 = vector.multi_reduction <add>, %64, %cst_71 [1] : vector<4x256xf32> to vector<4xf32>
    %66 = vector.shape_cast %65 : vector<4xf32> to vector<4x1xf32>
    %cst_72 = arith.constant 3.906250e-03 : f32
    %67 = vector.broadcast %cst_72 : f32 to vector<4x1xf32>
    %68 = arith.mulf %66, %67 : vector<4x1xf32>
    %cst_73 = arith.constant 0.000000e+00 : f32
    %69 = vector.broadcast %cst_73 : f32 to vector<4x1xf32>
    %70 = arith.subf %69, %68 : vector<4x1xf32>
    %71 = math.exp %70 : vector<4x1xf32>
    %cst_74 = arith.constant 1.000000e+00 : f32
    %72 = vector.broadcast %cst_74 : f32 to vector<4x1xf32>
    %73 = arith.addf %72, %71 : vector<4x1xf32>
    %cst_75 = arith.constant 1.000000e+00 : f32
    %74 = vector.broadcast %cst_75 : f32 to vector<4x1xf32>
    %75 = arith.divf %74, %73 : vector<4x1xf32>
    %76 = vector.broadcast %75 : vector<4x1xf32> to vector<4x256xf32>
    %77 = arith.mulf %62, %76 : vector<4x256xf32>
    %c0_76 = arith.constant 0 : index
    %c0_77 = arith.constant 0 : index
    %c0_78 = arith.constant 0 : index
    %78 = vector.load %arg6[%c0_76, %c0_77, %c0_78] : memref<1x4x256xf32, #tpu.memory_space<vmem>>, vector<1x4x256xf32>
    %79 = vector.shape_cast %78 : vector<1x4x256xf32> to vector<4x256xf32>
    %80 = vector.shape_cast %77 : vector<4x256xf32> to vector<1x4x256xf32>
    tpu.vector_store %arg6[%c0_76, %c0_77, %c0_78], %80 {strides = array<i32>} : memref<1x4x256xf32, #tpu.memory_space<vmem>>, vector<1x4x256xf32>,
    return
  }
  func.func @transform_0(%arg0: i32) -> (i32, i32, i32, i32) {
    %c0_i32 = arith.constant 0 : i32
    %c0_i32_0 = arith.constant 0 : i32
    %c0_i32_1 = arith.constant 0 : i32
    %c0_i32_2 = arith.constant 0 : i32
    return %arg0, %c0_i32, %c0_i32_0, %c0_i32_1 : i32, i32, i32, i32
  }
  func.func @transform_1(%arg0: i32) -> (i32, i32, i32) {
    %c0_i32 = arith.constant 0 : i32
    %c0_i32_0 = arith.constant 0 : i32
    %c0_i32_1 = arith.constant 0 : i32
    %c0_i32_2 = arith.constant 0 : i32
    return %c0_i32, %c0_i32_0, %c0_i32_1 : i32, i32, i32
  }
  func.func @transform_2(%arg0: i32) -> (i32, i32) {
    %c0_i32 = arith.constant 0 : i32
    %c0_i32_0 = arith.constant 0 : i32
    %c0_i32_1 = arith.constant 0 : i32
    return %c0_i32, %c0_i32_0 : i32, i32
  }
  func.func @transform_3(%arg0: i32) -> (i32, i32) {
    %c0_i32 = arith.constant 0 : i32
    %c0_i32_0 = arith.constant 0 : i32
    %c0_i32_1 = arith.constant 0 : i32
    return %c0_i32, %c0_i32_0 : i32, i32
  }
  func.func @transform_4(%arg0: i32) -> (i32, i32) {
    %c0_i32 = arith.constant 0 : i32
    %c0_i32_0 = arith.constant 0 : i32
    %c0_i32_1 = arith.constant 0 : i32
    return %c0_i32, %c0_i32_0 : i32, i32
  }
  func.func @transform_5(%arg0: i32) -> (i32, i32, i32) {
    %c0_i32 = arith.constant 0 : i32
    %c0_i32_0 = arith.constant 0 : i32
    %c0_i32_1 = arith.constant 0 : i32
    return %arg0, %c0_i32, %c0_i32_0 : i32, i32, i32
  }
}

</mosaic_0001>

<bundles_post_ra>
// kernel: gca_block_forward.1
= control target key start
LH: loop header
LB: loop body
LE: loop exit
PB: predicated region body
PF: predicated region fallthrough
CT: control target
= control target key end

     0   :  { %s1290_s18 = smov 0   ;;  %s1400_s0 = inlined_call_operand.vmem [shape: f32[2,9,4,256], index: 0, kind: input, shape index: {}]   ;;  %s1401_s1 = inlined_call_operand.vmem [shape: f32[9,4,4], index: 1, kind: input, shape index: {}]   ;;  %s1402_s2 = inlined_call_operand.vmem [shape: f32[4,1], index: 2, kind: input, shape index: {}]   ;;  %s1403_s3 = inlined_call_operand.vmem [shape: f32[4,1], index: 3, kind: input, shape index: {}]   ;;  %s1404_s4 = inlined_call_operand.vmem [shape: f32[4,4], index: 4, kind: input, shape index: {}]   ;;  %s1405_s5 = inlined_call_operand.vmem [shape: f32[2,4,256], index: 5, kind: output, shape index: {}]  }
   0x1 LB: > { %s1168_s19 = sadd.s32 4294967295, %s1256_s18   ;;  %p1172_p0 = scmp.ge.s32.totalorder %s1256_s18, 1  ;;  %s1256_s18 = sphi %s1290_s18, %s15_s18  }
   0x2   : > { %p187_p1 = scmp.lt.s32.totalorder %s1256_s18, 3 }
   0x4   : > { %p188_p2 = pnand %p1172_p0, %p187_p1 }
   0x5   : > { %p215_p3 = scmp.lt.s32.totalorder (!%p188_p2), %s1168_s19, 1 }
   0x6   : > { %191 = sbr.rel (%p188_p2) target bundleno = 618 (0x26a), region = 40 }
   0xb   : > { %v1258_v0 = vmov 0.0   ;;  %s1407_s19 = smov (!%p215_p3, %s1168_s19), 1  ;;  %v1259_v1 = vmov 0   ;;  %v995_v2 = vld [vmem:[%s1402_s2] sm:$0xf]  ;;  %vm237_vm0 = vcmask 1043456  }
   0xc   : > { %306 = vmatprep.mubr.f32.mxu0 %v1258_v0  ;;  %386 = vmatprep.mubr.f32.mxu1 %v1258_v0  ;;  %s1225_s20 = smul.u32 72, %s1407_s19  ;;  %v1003_v3 = vld [vmem:[%s1403_s3] sm:$0xf]  ;;  %v1176_v10 = vld [vmem:[%s1401_s1 + $0x4] sm:$0xf]  ;;  %vm233_vm1 = vcmask 31744  }
   0xd   : > { %1236 = vset.pattern.permute.xlu0 %v1259_v1  ;;  %v225_v11 = vld [vmem:[%s1401_s1] sm:$0xf]  ;;  %v1184_v16 = vld [vmem:[%s1401_s1 + $0x8] sm:$0xf]  ;;  %v1189_v17 = vld [vmem:[%s1401_s1 + $0xc] sm:$0xf] }
   0xe   : > { %998 = vperm.xlu0 %1236, %v995_v2   ;;  %s1309_s25 = scalar_lea.vmem %s1400_s0, %s1225_s20  ;;  %v1194_v22 = vld [vmem:[%s1401_s1 + $0x10] sm:$0xf]  ;;  %v1199_v23 = vld [vmem:[%s1401_s1 + $0x14] sm:$0xf]  ;;  %v1204_v27 = vld [vmem:[%s1401_s1 + $0x18] sm:$0xf] }
   0xf   : > { %v1177_v4 = vld [vmem:[%s1309_s25 + $0x8] sm:$0xff]  ;;  %v226_v5 = vld [vmem:[%s1309_s25] sm:$0xff]  ;;  %v1185_v6 = vld [vmem:[%s1309_s25 + $0x10] sm:$0xff] }
  0x10   : > { %v232_v7 = vcombine.high %v1177_v4, %v1177_v4  ;;  %v314_v8 = vcombine.high %v226_v5, %v226_v5  ;;  %v1190_v9 = vld [vmem:[%s1309_s25 + $0x18] sm:$0xff]  ;;  %v398_v12 = vcombine.high %v1185_v6, %v1185_v6  ;;  %v1195_v14 = vld [vmem:[%s1309_s25 + $0x20] sm:$0xff]  ;;  %v1200_v15 = vld [vmem:[%s1309_s25 + $0x28] sm:$0xff] }
  0x11   : > { %v484_v13 = vcombine.high %v1190_v9, %v1190_v9  ;;  %v570_v18 = vcombine.high %v1195_v14, %v1195_v14  ;;  %v656_v19 = vcombine.high %v1200_v15, %v1200_v15  ;;  %v1205_v20 = vld [vmem:[%s1309_s25 + $0x30] sm:$0xff]  ;;  %v1210_v21 = vld [vmem:[%s1309_s25 + $0x38] sm:$0xff]  ;;  %v1215_v26 = vld [vmem:[%s1309_s25 + $0x40] sm:$0xff]  ;;  %s1224_s25 = sshll.u32 %s1407_s19, 3 }
  0x12   : > { %1006 = vperm.xlu0 %1236, %v1003_v3   ;;  %1178 = vmatprep.subr.msk.mxu0 %vm237_vm0, %v232_v7  ;;  %v742_v24 = vcombine.high %v1205_v20, %v1205_v20  ;;  %v828_v25 = vcombine.high %v1210_v21, %v1210_v21  ;;  %v1209_v28 = vld [vmem:[%s1401_s1 + $0x1c] sm:$0xf]  ;;  %v914_v29 = vcombine.high %v1215_v26, %v1215_v26  ;;  %v1214_v30 = vld [vmem:[%s1401_s1 + $0x20] sm:$0xf]  ;;  %s224_s28 = scalar_lea.vmem %s1405_s5, %s1224_s25 }
  0x13   : > { %1181 = vmatprep.subr.msk.mxu1 %vm237_vm0, %v314_v8  ;;  %1179 = vmatpush1.msk.msra.mxu0 %vm237_vm0, %v1177_v4 }
  0x14   : > { %1182 = vmatpush1.msk.msra.mxu1 %vm237_vm0, %v226_v5  ;;  %1180 = vmatmul.mubr.msk.f32.vlgmr.msra.gmra.mxu0 %vm233_vm1, %v1176_v10 }
  0x15   : > { %1183 = vmatmul.mubr.msk.f32.vlgmr.msra.gmra.mxu1 %vm233_vm1, %v225_v11  ;;  %1186 = vmatprep.subr.msk.mxu0 %vm237_vm0, %v398_v12 }
  0x16   : > { %1191 = vmatprep.subr.msk.mxu1 %vm237_vm0, %v484_v13  ;;  %1187 = vmatpush1.msk.msra.mxu0 %vm237_vm0, %v1185_v6 }
  0x17   : > { %470 = vmatprep.mubr.f32.mxu0 %v1258_v0  ;;  %1192 = vmatpush1.msk.msra.mxu1 %vm237_vm0, %v1190_v9  ;;  %v1013_v9 = vld [vmem:[%s1404_s4] sm:$0xf] }
  0x18   : > { %556 = vmatprep.mubr.f32.mxu1 %v1258_v0  ;;  %1188 = vmatmul.mubr.msk.f32.vlgmr.msra.gmra.mxu0 %vm233_vm1, %v1184_v16 }
  0x19   : > { %1193 = vmatmul.mubr.msk.f32.vlgmr.msra.gmra.mxu1 %vm233_vm1, %v1189_v17  ;;  %1196 = vmatprep.subr.msk.mxu0 %vm237_vm0, %v570_v18 }
  0x1a   : > { %1201 = vmatprep.subr.msk.mxu1 %vm237_vm0, %v656_v19  ;;  %1197 = vmatpush1.msk.msra.mxu0 %vm237_vm0, %v1195_v14 }
  0x1b   : > { %642 = vmatprep.mubr.f32.mxu0 %v1258_v0  ;;  %1202 = vmatpush1.msk.msra.mxu1 %vm237_vm0, %v1200_v15 }
  0x1c   : > { %728 = vmatprep.mubr.f32.mxu1 %v1258_v0  ;;  %1198 = vmatmul.mubr.msk.f32.vlgmr.msra.gmra.mxu0 %vm233_vm1, %v1194_v22 }
  0x1d   : > { %1203 = vmatmul.mubr.msk.f32.vlgmr.msra.gmra.mxu1 %vm233_vm1, %v1199_v23  ;;  %1206 = vmatprep.subr.msk.mxu0 %vm237_vm0, %v742_v24 }
  0x1e   : > { %1211 = vmatprep.subr.msk.mxu1 %vm237_vm0, %v828_v25  ;;  %1207 = vmatpush1.msk.msra.mxu0 %vm237_vm0, %v1205_v20 }
  0x1f   : > { %814 = vmatprep.mubr.f32.mxu0 %v1258_v0  ;;  %1212 = vmatpush1.msk.msra.mxu1 %vm237_vm0, %v1210_v21 }
  0x20   : > { %900 = vmatprep.mubr.f32.mxu1 %v1258_v0  ;;  %1208 = vmatmul.mubr.msk.f32.vlgmr.msra.gmra.mxu0 %vm233_vm1, %v1204_v27 }
  0x21   : > { %1213 = vmatmul.mubr.msk.f32.vlgmr.msra.gmra.mxu1 %vm233_vm1, %v1209_v28  ;;  %1216 = vmatprep.subr.msk.mxu0 %vm237_vm0, %v914_v29 }
  0x22   : > { %986 = vmatprep.mubr.f32.mxu0 %v1258_v0  ;;  %1217 = vmatpush1.msk.msra.mxu0 %vm237_vm0, %v1215_v26 }
  0x23   : > { %1087 = vmatprep.mubr.f32.mxu1 %v1258_v0 }
  0x24   : > { %1218 = vmatmul.mubr.msk.f32.vlgmr.msra.gmra.mxu0 %vm233_vm1, %v1214_v30 }
  0x89   : > { %v999_v58 = vpop.permute.xlu0 %998 }
  0x8d   : > { %v1007_v3 = vpop.permute.xlu0 %1006 }
  0xd4   : > { %v308_v31 = vpop.f32.mrf.mxu0 }
  0xd5   : > { %v388_v32 = vpop.f32.mrf.mxu1 }
  0xd6   : > { %v310_v33 = vpop.f32.mrf.mxu0  ;;  %v389_v35 = vadd.f32 %v388_v32, %v308_v31 }
  0xd7   : > { %v390_v34 = vpop.f32.mrf.mxu1 }
  0xd8   : > { %v472_v36 = vpop.f32.mrf.mxu0  ;;  %v391_v38 = vadd.f32 %v390_v34, %v310_v33 }
  0xd9   : > { %v558_v37 = vpop.f32.mrf.mxu1  ;;  %v477_v39 = vadd.f32 %v472_v36, %v389_v35 }
  0xda   : > { %v474_v40 = vpop.f32.mrf.mxu0 }
  0xdb   : > { %v560_v41 = vpop.f32.mrf.mxu1  ;;  %v563_v42 = vadd.f32 %v558_v37, %v477_v39  ;;  %v478_v43 = vadd.f32 %v474_v40, %v391_v38 }
  0xdc   : > { %v644_v44 = vpop.f32.mrf.mxu0 }
  0xdd   : > { %v730_v45 = vpop.f32.mrf.mxu1  ;;  %v564_v46 = vadd.f32 %v560_v41, %v478_v43  ;;  %v649_v47 = vadd.f32 %v644_v44, %v563_v42 }
  0xde   : > { %v646_v48 = vpop.f32.mrf.mxu0 }
  0xdf   : > { %v732_v49 = vpop.f32.mrf.mxu1  ;;  %v735_v50 = vadd.f32 %v730_v45, %v649_v47  ;;  %v650_v51 = vadd.f32 %v646_v48, %v564_v46 }
  0xe0   : > { %v816_v52 = vpop.f32.mrf.mxu0 }
  0xe1   : > { %v902_v53 = vpop.f32.mrf.mxu1  ;;  %v736_v54 = vadd.f32 %v732_v49, %v650_v51  ;;  %v821_v55 = vadd.f32 %v816_v52, %v735_v50 }
  0xe2   : > { %v818_v56 = vpop.f32.mrf.mxu0 }
  0xe3   : > { %v907_v57 = vadd.f32 %v902_v53, %v821_v55  ;;  %v822_v59 = vadd.f32 %v818_v56, %v736_v54  ;;  %v904_v60 = vpop.f32.mrf.mxu1 }
  0xe4   : > { %v988_v61 = vpop.f32.mrf.mxu0 }
  0xe5   : > { %v908_v62 = vadd.f32 %v904_v60, %v822_v59  ;;  %v993_v63 = vadd.f32 %v988_v61, %v907_v57 }
  0xe6   : > { %v990_v0 = vpop.f32.mrf.mxu0 }
  0xe7   : > { %v1001_v1 = vmul.f32 %v999_v58, %v993_v63  ;;  %v994_v2 = vadd.f32 %v990_v0, %v908_v62 }
  0xe9   : > { %v1002_v4 = vmul.f32 %v999_v58, %v994_v2  ;;  %v1009_v5 = vadd.f32 %v1007_v3, %v1001_v1 }
  0xeb   : > { %v1010_v6 = vadd.f32 %v1007_v3, %v1002_v4  ;;  %v1011_v8 = vmax.f32 %v1009_v5, 0.0 }
  0xed   : > { %v1012_v7 = vmax.f32 %v1010_v6, 0.0 }
  0xef   : > { %1219 = vmatprep.subr.msk.mxu1 %vm237_vm0, %v1012_v7 }
  0xf0   : > { %1220 = vmatpush1.msk.msra.mxu1 %vm237_vm0, %v1011_v8 }
  0xf1   : > { %1221 = vmatmul.mubr.msk.f32.vlgmr.msra.gmra.mxu1 %vm233_vm1, %v1013_v9 }
 0x1b1   : > { %v1089_v10 = vpop.f32.mrf.mxu1 }
 0x1b2   : > { %v1094_v12 = vsel %vm237_vm0, %v1089_v10, 0.0 }
 0x1b3   : > { %v1091_v11 = vpop.f32.mrf.mxu1 }
 0x1b4   : > { %v1095_v13 = vsel %vm237_vm0, %v1091_v11, 0.0 }
 0x1b5   : > { %v1096_v14 = vadd.f32 %v1095_v13, %v1094_v12 }
 0x1b7   : > { %1097 = vadd.xlane.f32.xlu1 %v1096_v14 }
 0x240   : > { %v1098_v15 = vpop.xlane.xlu1 %1097 }
 0x241   : > { %v1099_v16 = vmul.f32 0.00390625, %v1098_v15 }
 0x243   : > { %v1100_v17 = vsub.f32 0.0, %v1099_v16 }
 0x245   : > { %v1101_v18 = vmul.f32 1.442695, %v1100_v17 }
 0x247   : > { %1246 = vpow2.f32 %v1101_v18 }
 0x254   : > { %v1247_v19 = vpop.eup %1246 }
 0x255   : > { %v1103_v20 = vadd.f32 1.0, %v1247_v19 }
 0x257   : > { %1248 = vrcp.f32 %v1103_v20 }
 0x264   : > { %v1249_v21 = vpop.eup %1248 }
 0x265   : > { %v1106_v22 = vmul.f32 %v1249_v21, %v1011_v8  ;;  %v1107_v23 = vmul.f32 %v1249_v21, %v1012_v7 }
 0x267   : > { %v1110_v24 = vcombine.low %v1106_v22, %v1107_v23 }
 0x269   : > { %1112 = vst [vmem:[%s224_s28] sm:$0xff] %v1110_v24 }
 0x26a PF: > { %s15_s18 = sadd.s32 1, %s1256_s18  }
 0x26b   : > { %p12_p4 = scmp.ge.s32.totalorder %s15_s18, 4  }
 0x26d   :  { %14 = sbr.rel (!%p12_p4) target bundleno = 1 (0x1), region = 86 }

</bundles_post_ra>
